<compile_context>
chip_gen: v7x
topology: tpu7x:2x2x1
jax: 0.10.0
libtpu: 0.0.40
codegen_flags: <defaults>
</compile_context>

<pallas_src>
import jax
import jax.numpy as jnp
from jax.experimental import pallas as pl
from jax.experimental.pallas import tpu as pltpu


def _round_up(x, m):
    return (x + m - 1) // m * m


def _sublane_multiple(dtype):
    # Native sublane packing: f32 -> 8, bf16 -> 16, int8/fp8 -> 32.
    return max(8, 32 // jnp.dtype(dtype).itemsize)


def _vmem_capacity_bytes():
    try:
        info = pltpu.get_tpu_info()
        return int(getattr(info, "vmem_capacity_bytes", 64 << 20))
    except Exception:
        return 64 << 20  # conservative (v7x-sized) fallback


def simple_cls_head_kernel(x_ref, w_ref, b_ref, o_ref):
    # tanh in the input's native dtype (VPU/EUP), one MXU matmul with f32
    # accumulation, f32 bias row-broadcast add, single cast on store.
    h = jnp.tanh(x_ref[...])                                            # (TB, 2H)
    out = jnp.dot(h, w_ref[...], preferred_element_type=jnp.float32)    # (TB, Lp) f32
    o_ref[...] = (out + b_ref[...]).astype(o_ref.dtype)


def prepare_params(params):
    """One-time parameter prep (hoisted out of the forward path).

    params: {"w": (num_labels, 2*hidden) torch layout, "b": (num_labels,)}
    Returns the transposed weight padded to a lane-dense (2H, L_pad) slab and the
    bias as a zero-padded f32 (1, L_pad) row, plus the true num_labels.
    """
    w, b = params["w"], params["b"]
    num_labels, in_features = w.shape
    l_pad = _round_up(num_labels, 128)
    w_t = jnp.zeros((in_features, l_pad), dtype=w.dtype).at[:, :num_labels].set(w.T)
    b_r = jnp.zeros((1, l_pad), dtype=jnp.float32).at[:, :num_labels].set(
        b.astype(jnp.float32))
    return {"w_t": w_t, "b_r": b_r, "num_labels": num_labels}


def simple_cls_head_forward(x, prepped, *, block_batch=None):
    """x: (batch, 2*hidden) -> (batch, num_labels)."""
    w_t, b_r = prepped["w_t"], prepped["b_r"]
    num_labels = prepped["num_labels"]
    batch, in_features = x.shape
    l_pad = w_t.shape[1]

    out_dtype = x.dtype
    x_item = jnp.dtype(x.dtype).itemsize
    w_item = jnp.dtype(w_t.dtype).itemsize
    out_item = jnp.dtype(out_dtype).itemsize
    sub = max(_sublane_multiple(x.dtype), _sublane_multiple(out_dtype))

    # --- per-generation VMEM budget and batch tile ----------------------------
    cap = _vmem_capacity_bytes()                       # physical VMEM per core
    budget = min(cap * 3 // 4, 100 << 20)              # ~48 MiB v7x, ~96 MiB v5e/v6e
    w_slab = in_features * l_pad * w_item + l_pad * 4  # resident weight + f32 bias
    per_row = 2 * in_features * x_item + 2 * l_pad * out_item  # dbl-buffered x/out rows
    avail = budget - 2 * w_slab - (2 << 20)            # worst case: weights 2-buffered
    if avail > sub * per_row:
        tb_cap = max(sub, int(avail // per_row) // sub * sub)
    else:
        tb_cap = sub

    want = int(block_batch) if block_batch is not None else 1024
    tb = max(sub, min(want, tb_cap, _round_up(batch, sub)))
    tb = _round_up(tb, sub)

    # Small-VMEM (v7x-like) parts have 2 TensorCores: keep >= 2 parallel grid steps.
    if cap <= (64 << 20) and batch >= 2 * sub:
        tb = min(tb, _round_up(pl.cdiv(batch, 2), sub))

    # If one tile covers the whole batch, use a full-extent block (no masking).
    if tb >= batch:
        tb = batch

    grid = (pl.cdiv(batch, tb),)

    vmem_bytes = (2 * w_slab + 2 * tb * in_features * x_item
                  + 2 * tb * l_pad * out_item + (2 << 20))
    vmem_limit = int(min(max(vmem_bytes, 8 << 20), min(cap - (8 << 20), 100 << 20)))

    cost = pl.CostEstimate(
        flops=2 * batch * in_features * l_pad,
        transcendentals=batch * in_features,            # tanh
        bytes_accessed=batch * in_features * x_item
        + batch * l_pad * out_item
        + in_features * l_pad * w_item + l_pad * 4,
    )

    def build(single_buffer_weights):
        if single_buffer_weights:
            # Constant index_map -> weights/bias never change; 1-deep buffer saves VMEM.
            w_spec = pl.BlockSpec((in_features, l_pad), lambda i: (0, 0),
                                  pipeline_mode=pl.Buffered(1))
            b_spec = pl.BlockSpec((1, l_pad), lambda i: (0, 0),
                                  pipeline_mode=pl.Buffered(1))
        else:
            w_spec = pl.BlockSpec((in_features, l_pad), lambda i: (0, 0))
            b_spec = pl.BlockSpec((1, l_pad), lambda i: (0, 0))
        return pl.pallas_call(
            simple_cls_head_kernel,
            out_shape=jax.ShapeDtypeStruct((batch, l_pad), out_dtype),
            grid=grid,
            in_specs=[
                pl.BlockSpec((tb, in_features), lambda i: (i, 0)),  # x tile (pipelined)
                w_spec,                                             # weight (resident)
                b_spec,                                             # bias (resident, f32)
            ],
            out_specs=pl.BlockSpec((tb, l_pad), lambda i: (i, 0)),
            compiler_params=pltpu.CompilerParams(
                dimension_semantics=("parallel",),
                vmem_limit_bytes=vmem_limit,
            ),
            cost_estimate=cost,
        )

    try:
        out = build(True)(x, w_t, b_r)
    except Exception:
        # This JAX version rejected Buffered(1); fall back to default 2-deep buffers.
        out = build(False)(x, w_t, b_r)

    return out[:, :num_labels]


def init_params(key, hidden_size, num_labels, dtype=jnp.float32):
    """Deterministic nn.Linear-style init (uniform +/- 1/sqrt(fan_in))."""
    k1, k2 = jax.random.split(key, 2)
    fan_in = 2 * hidden_size
    bound = 1.0 / jnp.sqrt(fan_in)
    return {
        "w": jax.random.uniform(k1, (num_labels, 2 * hidden_size), dtype, -bound, bound),
        "b": jax.random.uniform(k2, (num_labels,), dtype, -bound, bound),
    }


def reference_forward(x, params):
    return jnp.tanh(x) @ params["w"].T + params["b"]


if __name__ == "__main__":
    hidden = 32
    num_labels = 4

    key = jax.random.PRNGKey(0)
    kx, kp, kx2 = jax.random.split(key, 3)
    params = init_params(kp, hidden, num_labels)

    # --- f32 path, ragged batch (batch=2 not a multiple of the sublane tile) ---
    batch = 2
    x = jax.random.normal(kx, (batch, 2 * hidden), dtype=jnp.float32)
    prepped = prepare_params(params)            # one-time prep, hoisted out of forward
    out = jax.block_until_ready(simple_cls_head_forward(x, prepped))
    ref = reference_forward(x, params)
    assert out.shape == (batch, num_labels)
    assert jnp.allclose(out, ref, atol=1e-5, rtol=1e-5), "f32 mismatch vs JAX reference"

    # --- bf16 path (halves HBM traffic for x and the resident weight) ----------
    batch_b = 16
    xb = jax.random.normal(kx2, (batch_b, 2 * hidden), dtype=jnp.float32).astype(jnp.bfloat16)
    params_b = {"w": params["w"].astype(jnp.bfloat16), "b": params["b"]}
    out_b = jax.block_until_ready(
        simple_cls_head_forward(xb, prepare_params(params_b)))
    ref_b = (jnp.tanh(xb.astype(jnp.float32))
             @ params_b["w"].astype(jnp.float32).T + params["b"])
    assert out_b.shape == (batch_b, num_labels)
    assert jnp.allclose(out_b.astype(jnp.float32), ref_b, atol=5e-2, rtol=5e-2), \
        "bf16 mismatch vs JAX reference"

    print("KERNEL_OK")
</pallas_src>

<mosaic_0001>
module attributes {stable_mosaic.version = 11 : i64} {
  func.func @simple_cls_head_kernel(%arg0: i32, %arg1: memref<2x64xf32, #tpu.memory_space<vmem>>, %arg2: memref<64x128xf32, #tpu.memory_space<vmem>>, %arg3: memref<1x128xf32, #tpu.memory_space<vmem>>, %arg4: memref<2x128xf32, #tpu.memory_space<vmem>>) attributes {dimension_semantics = [#tpu.dimension_semantics<parallel>], iteration_bounds = array<i64: 1>, scalar_prefetch = 0 : i64, scratch_operands = 0 : i64, tpu.core_type = #tpu.core_type<tc>, window_params = [{transform_indices = @transform_0, window_bounds = array<i64: 2, 64>}, {pipeline_mode = #tpu.pipeline_mode<synchronous>, transform_indices = @transform_1, window_bounds = array<i64: 64, 128>}, {pipeline_mode = #tpu.pipeline_mode<synchronous>, transform_indices = @transform_2, window_bounds = array<i64: 1, 128>}, {transform_indices = @transform_3, window_bounds = array<i64: 2, 128>}]} {
    %c0 = arith.constant 0 : index
    %c0_0 = arith.constant 0 : index
    %0 = vector.load %arg1[%c0, %c0_0] : memref<2x64xf32, #tpu.memory_space<vmem>>, vector<2x64xf32>
    %1 = math.tanh %0 : vector<2x64xf32>
    %c0_1 = arith.constant 0 : index
    %c0_2 = arith.constant 0 : index
    %2 = vector.load %arg2[%c0_1, %c0_2] : memref<64x128xf32, #tpu.memory_space<vmem>>, vector<64x128xf32>
    %cst = arith.constant dense<0.000000e+00> : vector<2x128xf32>
    %3 = tpu.matmul %1, %2, %cst {dimension_numbers = #tpu.dot_dimension_numbers<[1], [0], [0], [1], [0, 0, 1, 1], [], []>} : vector<2x64xf32>, vector<64x128xf32>, vector<2x128xf32> -> vector<2x128xf32>
    %c0_3 = arith.constant 0 : index
    %c0_4 = arith.constant 0 : index
    %4 = vector.load %arg3[%c0_3, %c0_4] : memref<1x128xf32, #tpu.memory_space<vmem>>, vector<1x128xf32>
    %5 = vector.broadcast %4 : vector<1x128xf32> to vector<2x128xf32>
    %6 = arith.addf %3, %5 : vector<2x128xf32>
    %c0_5 = arith.constant 0 : index
    %c0_6 = arith.constant 0 : index
    %7 = vector.load %arg4[%c0_5, %c0_6] : memref<2x128xf32, #tpu.memory_space<vmem>>, vector<2x128xf32>
    tpu.vector_store %arg4[%c0_5, %c0_6], %6 {strides = array<i32>} : memref<2x128xf32, #tpu.memory_space<vmem>>, vector<2x128xf32>,
    return
  }
  func.func @transform_0(%arg0: i32) -> (i32, i32) {
    %c0_i32 = arith.constant 0 : i32
    %c0_i32_0 = arith.constant 0 : i32
    return %arg0, %c0_i32 : i32, i32
  }
  func.func @transform_1(%arg0: i32) -> (i32, i32) {
    %c0_i32 = arith.constant 0 : i32
    %c0_i32_0 = arith.constant 0 : i32
    %c0_i32_1 = arith.constant 0 : i32
    return %c0_i32, %c0_i32_0 : i32, i32
  }
  func.func @transform_2(%arg0: i32) -> (i32, i32) {
    %c0_i32 = arith.constant 0 : i32
    %c0_i32_0 = arith.constant 0 : i32
    %c0_i32_1 = arith.constant 0 : i32
    return %c0_i32, %c0_i32_0 : i32, i32
  }
  func.func @transform_3(%arg0: i32) -> (i32, i32) {
    %c0_i32 = arith.constant 0 : i32
    %c0_i32_0 = arith.constant 0 : i32
    return %arg0, %c0_i32 : i32, i32
  }
}

module attributes {stable_mosaic.version = 11 : i64} {
  func.func @simple_cls_head_kernel(%arg0: i32, %arg1: memref<2x64xf32, #tpu.memory_space<vmem>>, %arg2: memref<64x128xf32, #tpu.memory_space<vmem>>, %arg3: memref<1x128xf32, #tpu.memory_space<vmem>>, %arg4: memref<2x128xf32, #tpu.memory_space<vmem>>) attributes {dimension_semantics = [#tpu.dimension_semantics<parallel>], iteration_bounds = array<i64: 1>, scalar_prefetch = 0 : i64, scratch_operands = 0 : i64, tpu.core_type = #tpu.core_type<tc>, window_params = [{transform_indices = @transform_0, window_bounds = array<i64: 2, 64>}, {pipeline_mode = #tpu.pipeline_mode<synchronous>, transform_indices = @transform_1, window_bounds = array<i64: 64, 128>}, {pipeline_mode = #tpu.pipeline_mode<synchronous>, transform_indices = @transform_2, window_bounds = array<i64: 1, 128>}, {transform_indices = @transform_3, window_bounds = array<i64: 2, 128>}]} {
    %c0 = arith.constant 0 : index
    %c0_0 = arith.constant 0 : index
    %0 = vector.load %arg1[%c0, %c0_0] : memref<2x64xf32, #tpu.memory_space<vmem>>, vector<2x64xf32>
    %1 = math.tanh %0 : vector<2x64xf32>
    %c0_1 = arith.constant 0 : index
    %c0_2 = arith.constant 0 : index
    %2 = vector.load %arg2[%c0_1, %c0_2] : memref<64x128xf32, #tpu.memory_space<vmem>>, vector<64x128xf32>
    %cst = arith.constant dense<0.000000e+00> : vector<2x128xf32>
    %3 = tpu.matmul %1, %2, %cst {dimension_numbers = #tpu.dot_dimension_numbers<[1], [0], [0], [1], [0, 0, 1, 1], [], []>} : vector<2x64xf32>, vector<64x128xf32>, vector<2x128xf32> -> vector<2x128xf32>
    %c0_3 = arith.constant 0 : index
    %c0_4 = arith.constant 0 : index
    %4 = vector.load %arg3[%c0_3, %c0_4] : memref<1x128xf32, #tpu.memory_space<vmem>>, vector<1x128xf32>
    %5 = vector.broadcast %4 : vector<1x128xf32> to vector<2x128xf32>
    %6 = arith.addf %3, %5 : vector<2x128xf32>
    %c0_5 = arith.constant 0 : index
    %c0_6 = arith.constant 0 : index
    %7 = vector.load %arg4[%c0_5, %c0_6] : memref<2x128xf32, #tpu.memory_space<vmem>>, vector<2x128xf32>
    tpu.vector_store %arg4[%c0_5, %c0_6], %6 {strides = array<i32>} : memref<2x128xf32, #tpu.memory_space<vmem>>, vector<2x128xf32>,
    return
  }
  func.func @transform_0(%arg0: i32) -> (i32, i32) {
    %c0_i32 = arith.constant 0 : i32
    %c0_i32_0 = arith.constant 0 : i32
    return %arg0, %c0_i32 : i32, i32
  }
  func.func @transform_1(%arg0: i32) -> (i32, i32) {
    %c0_i32 = arith.constant 0 : i32
    %c0_i32_0 = arith.constant 0 : i32
    %c0_i32_1 = arith.constant 0 : i32
    return %c0_i32, %c0_i32_0 : i32, i32
  }
  func.func @transform_2(%arg0: i32) -> (i32, i32) {
    %c0_i32 = arith.constant 0 : i32
    %c0_i32_0 = arith.constant 0 : i32
    %c0_i32_1 = arith.constant 0 : i32
    return %c0_i32, %c0_i32_0 : i32, i32
  }
  func.func @transform_3(%arg0: i32) -> (i32, i32) {
    %c0_i32 = arith.constant 0 : i32
    %c0_i32_0 = arith.constant 0 : i32
    return %arg0, %c0_i32 : i32, i32
  }
}

</mosaic_0001>

<bundles_post_ra>
// kernel: tpu_custom_call.1
= control target key start
LH: loop header
LB: loop body
LE: loop exit
PB: predicated region body
PF: predicated region fallthrough
CT: control target
= control target key end

     0   :  { %8 = vsyncpa [#allocation3], 0  ;;  %s347_s0 = inlined_call_operand.hbm [shape: f32[2,64], index: 0, kind: input, shape index: {}]   ;;  %s348_s1 = inlined_call_operand.hbm [shape: f32[64,128], index: 1, kind: input, shape index: {}]   ;;  %s349_s2 = inlined_call_operand.vmem [shape: f32[1,128], index: 2, kind: input, shape index: {}]   ;;  %s350_s3 = inlined_call_operand.hbm [shape: f32[2,128], index: 3, kind: output, shape index: {}]  }
   0x1   :  { %9 = vsyncpa [#allocation6], 0 }
   0x2   :  { %10 = vsyncpa [#allocation4], 0  ;;  %s273_s12 = smov [#allocation2]   ;;  %s274_s14 = smov [#allocation5]  }
   0x3   :  { %s17_s13 = sshll.u32 %s273_s12, 4  ;;  %s26_s15 = sshll.u32 %s274_s14, 4  ;;  %s18_s13 = int_to_ptr.vmem [resolvable:$true] %s17_s13  ;;  %s301_s15 = int_to_ptr.vmem [resolvable:$true] %s26_s15 }
   0x4   :  { %s201_s18 = scalar_lea.hbm %s347_s0, 32 }
   0x5   :  { %p202_p0 = scmp.ne.s32.totalorder %s347_s0, %s201_s18  ;;  %p205_p1 = scmp.lt.u32.totalorder %s201_s18, %s347_s0 }
   0x7   :  { %p207_p2 = pnand %p205_p1, %p202_p0 }
   0x9   :  { %210 = shalt.err (!%p207_p2)
}
   0xa   :  { %s211_s23 = scalar_lea.vmem %s18_s13, 32  ;;  %p216_p4 = scmp.lt.s32.totalorder %s18_s13, %s18_s13 }
   0xb   :  { %p212_p3 = scmp.ne.s32.totalorder %s18_s13, %s211_s23  ;;  %p217_p5 = scmp.lt.s32.totalorder %s211_s23, %s211_s23 }
   0xd   :  { %p218_p6 = por %p217_p5, %p216_p4 }
   0xf   :  { %p219_p7 = pnand %p218_p6, %p212_p3 }
  0x11   :  { %222 = shalt.err (!%p219_p7)
}
  0x12   :  { %20 = dma.hbm_to_vmem [thread:$0]  %s347_s0, 32, %s18_s13, [#allocation3]  }
  0x13   :  { %s223_s28 = scalar_lea.hbm %s348_s1, 1024 }
  0x14   :  { %p224_p8 = scmp.ne.s32.totalorder %s348_s1, %s223_s28  ;;  %p227_p9 = scmp.lt.u32.totalorder %s223_s28, %s348_s1 }
  0x16   :  { %p229_p10 = pnand %p227_p9, %p224_p8 }
  0x18   :  { %232 = shalt.err (!%p229_p10)
}
  0x19   :  { %s233_s6 = scalar_lea.vmem %s301_s15, 1024  ;;  %p238_p12 = scmp.lt.s32.totalorder %s301_s15, %s301_s15 }
  0x1a   :  { %p234_p11 = scmp.ne.s32.totalorder %s301_s15, %s233_s6  ;;  %p239_p13 = scmp.lt.s32.totalorder %s233_s6, %s233_s6 }
  0x1c   :  { %p240_p0 = por %p239_p13, %p238_p12 }
  0x1e   :  { %p241_p1 = pnand %p240_p0, %p234_p11 }
  0x20   :  { %244 = shalt.err (!%p241_p1)
}
  0x21   :  { %s275_s0 = smov 128   ;;  %s276_s7 = smov 8  }
  0x22   :  { %32 = dma.hbm_to_vmem [thread:$0]  %s348_s1, 1024, %s301_s15, [#allocation6], %s275_s0, %s275_s0, %s276_s7  }
  0x23   :  { %267 = dma.done.wait [#allocation3], 32  }
  0x24   :  { %268 = vsyncadd [#allocation3], 4294967264 }
  0x25   :  { %269 = dma.done.wait [#allocation6], 1024  }
  0x26   :  { %270 = vsyncadd [#allocation6], 4294966272  ;;  %v277_v0 = vmov 0.0|0.0   ;;  %vm278_vm0 = vmmov 0   ;;  %v279_v1 = vmov 0.0   ;;  %v43_v2 = vld [vmem:[#allocation5] sm:$0xff] }
  0x27   :  { %179 = vmatprep.subr.bf16.mxu0 %v277_v0  ;;  %176 = vmatprep.mubr.msk.f32.mxu0 %vm278_vm0, %v279_v1  ;;  %v44_v3 = vld [vmem:[#allocation5 + $0x8] sm:$0xff]  ;;  %v45_v4 = vld [vmem:[#allocation5 + $0x10] sm:$0xff]  ;;  %v46_v6 = vld [vmem:[#allocation5 + $0x18] sm:$0xff]  ;;  %vm58_vm1 = vcmask 523264   ;;  %s280_s11 = smov [#allocation7]  }
  0x28   :  { %v180_v5 = vpack.c.bf16 %v44_v3, %v43_v2  ;;  %v41_v7 = vld [vmem:[#allocation2] sm:$0x3]  ;;  %v183_v8 = vpack.c.bf16 %v46_v6, %v45_v4  ;;  %v47_v9 = vld [vmem:[#allocation5 + $0x20] sm:$0xff]  ;;  %v48_v10 = vld [vmem:[#allocation5 + $0x28] sm:$0xff]  ;;  %s139_s12 = sshll.u32 %s280_s11, 4  ;;  %s140_s12 = int_to_ptr.vmem [resolvable:$true] %s139_s12 }
  0x29   :  { %199 = vtanh.f32 %v41_v7  ;;  %v186_v11 = vpack.c.bf16 %v48_v10, %v47_v9  ;;  %v49_v12 = vld [vmem:[#allocation5 + $0x30] sm:$0xff]  ;;  %v50_v13 = vld [vmem:[#allocation5 + $0x38] sm:$0xff]  ;;  %s245_s13 = scalar_lea.vmem %s140_s12, 32  ;;  %p250_p3 = scmp.lt.s32.totalorder %s140_s12, %s140_s12 }
  0x2a   :  { %181 = vmatpush3.bf16.msra.mxu0 %v180_v5  ;;  %v189_v14 = vpack.c.bf16 %v50_v13, %v49_v12  ;;  %v149_v16 = vld [vmem:[%s349_s2] ss:$0 sm:$0xff]  ;;  %p246_p2 = scmp.ne.s32.totalorder %s140_s12, %s245_s13  ;;  %p251_p4 = scmp.lt.s32.totalorder %s245_s13, %s245_s13 }
  0x2b   :  { %182 = vmatprep.subr.bf16.mxu0 %v277_v0 }
  0x2c   :  { %p252_p5 = por %p251_p4, %p250_p3 }
  0x2e   :  { %184 = vmatpush3.bf16.msra.mxu0 %v183_v8  ;;  %p253_p6 = pnand %p252_p5, %p246_p2 }
  0x2f   :  { %185 = vmatprep.subr.bf16.mxu0 %v277_v0 }
  0x32   :  { %187 = vmatpush3.bf16.msra.mxu0 %v186_v11 }
  0x33   :  { %188 = vmatprep.subr.bf16.mxu0 %v277_v0  ;;  %v200_v15 = vpop.eup %199 }
  0x36   :  { %190 = vmatpush3.bf16.msra.mxu0 %v189_v14 }
  0x39   :  { %177 = vmatmul.mubr.msk.f32.vlgmr.msra.gmra.mrb[0].mxu0 %vm58_vm1, %v200_v15 }
 0x10c   :  { %v128_v17 = vpop.f32.mrb[0].mxu0 }
 0x10d   :  { %v129_v18 = vadd.f32 %v149_v16, %v128_v17  ;;  %v178_v19 = vpop.f32.mrb[1].mxu0 }
 0x10f   :  { %132 = vst [vmem:[#allocation7] sm:$0x3] %v129_v18 }
 0x110   :  { %256 = shalt.err (!%p253_p6)
}
 0x111   :  { %s257_s16 = scalar_lea.hbm %s350_s3, 32 }
 0x112   :  { %p258_p7 = scmp.ne.s32.totalorder %s350_s3, %s257_s16  ;;  %p261_p8 = scmp.lt.u32.totalorder %s257_s16, %s350_s3 }
 0x114   :  { %p263_p9 = pnand %p261_p8, %p258_p7 }
 0x116   :  { %266 = shalt.err (!%p263_p9)
}
 0x117   :  { %142 = dma.vmem_to_hbm [thread:$0]  %s140_s12, 32, %s350_s3, [#allocation4]  }
 0x118   :  { %271 = dma.done.wait [#allocation4], 32  }
 0x119   :  { %272 = vsyncadd [#allocation4], 4294967264 }
 0x11a   :  { %146 = vsyncpa [#allocation3], 1 }
 0x11b   :  { %147 = vsyncpa [#allocation6], 1 }
 0x11c   :  { %148 = vsyncpa [#allocation4], 1 }

// kernel: tpu_custom_call.1
= control target key start
LH: loop header
LB: loop body
LE: loop exit
PB: predicated region body
PF: predicated region fallthrough
CT: control target
= control target key end

     0   :  { %8 = vsyncpa [#allocation3], 0  ;;  %s347_s0 = inlined_call_operand.hbm [shape: f32[2,64], index: 0, kind: input, shape index: {}]   ;;  %s348_s1 = inlined_call_operand.hbm [shape: f32[64,128], index: 1, kind: input, shape index: {}]   ;;  %s349_s2 = inlined_call_operand.vmem [shape: f32[1,128], index: 2, kind: input, shape index: {}]   ;;  %s350_s3 = inlined_call_operand.hbm [shape: f32[2,128], index: 3, kind: output, shape index: {}]  }
   0x1   :  { %9 = vsyncpa [#allocation6], 0 }
   0x2   :  { %10 = vsyncpa [#allocation4], 0  ;;  %s273_s12 = smov [#allocation2]   ;;  %s274_s14 = smov [#allocation5]  }
   0x3   :  { %s17_s13 = sshll.u32 %s273_s12, 4  ;;  %s26_s15 = sshll.u32 %s274_s14, 4  ;;  %s18_s13 = int_to_ptr.vmem [resolvable:$true] %s17_s13  ;;  %s301_s15 = int_to_ptr.vmem [resolvable:$true] %s26_s15 }
   0x4   :  { %s201_s18 = scalar_lea.hbm %s347_s0, 32 }
   0x5   :  { %p202_p0 = scmp.ne.s32.totalorder %s347_s0, %s201_s18  ;;  %p205_p1 = scmp.lt.u32.totalorder %s201_s18, %s347_s0 }
   0x7   :  { %p207_p2 = pnand %p205_p1, %p202_p0 }
   0x9   :  { %210 = shalt.err (!%p207_p2)
}
   0xa   :  { %s211_s23 = scalar_lea.vmem %s18_s13, 32  ;;  %p216_p4 = scmp.lt.s32.totalorder %s18_s13, %s18_s13 }
   0xb   :  { %p212_p3 = scmp.ne.s32.totalorder %s18_s13, %s211_s23  ;;  %p217_p5 = scmp.lt.s32.totalorder %s211_s23, %s211_s23 }
   0xd   :  { %p218_p6 = por %p217_p5, %p216_p4 }
   0xf   :  { %p219_p7 = pnand %p218_p6, %p212_p3 }
  0x11   :  { %222 = shalt.err (!%p219_p7)
}
  0x12   :  { %20 = dma.hbm_to_vmem [thread:$0]  %s347_s0, 32, %s18_s13, [#allocation3]  }
  0x13   :  { %s223_s28 = scalar_lea.hbm %s348_s1, 1024 }
  0x14   :  { %p224_p8 = scmp.ne.s32.totalorder %s348_s1, %s223_s28  ;;  %p227_p9 = scmp.lt.u32.totalorder %s223_s28, %s348_s1 }
  0x16   :  { %p229_p10 = pnand %p227_p9, %p224_p8 }
  0x18   :  { %232 = shalt.err (!%p229_p10)
}
  0x19   :  { %s233_s6 = scalar_lea.vmem %s301_s15, 1024  ;;  %p238_p12 = scmp.lt.s32.totalorder %s301_s15, %s301_s15 }
  0x1a   :  { %p234_p11 = scmp.ne.s32.totalorder %s301_s15, %s233_s6  ;;  %p239_p13 = scmp.lt.s32.totalorder %s233_s6, %s233_s6 }
  0x1c   :  { %p240_p0 = por %p239_p13, %p238_p12 }
  0x1e   :  { %p241_p1 = pnand %p240_p0, %p234_p11 }
  0x20   :  { %244 = shalt.err (!%p241_p1)
}
  0x21   :  { %s275_s0 = smov 128   ;;  %s276_s7 = smov 8  }
  0x22   :  { %32 = dma.hbm_to_vmem [thread:$0]  %s348_s1, 1024, %s301_s15, [#allocation6], %s275_s0, %s275_s0, %s276_s7  }
  0x23   :  { %267 = dma.done.wait [#allocation3], 32  }
  0x24   :  { %268 = vsyncadd [#allocation3], 4294967264 }
  0x25   :  { %269 = dma.done.wait [#allocation6], 1024  }
  0x26   :  { %270 = vsyncadd [#allocation6], 4294966272  ;;  %v277_v0 = vmov 0.0|0.0   ;;  %vm278_vm0 = vmmov 0   ;;  %v279_v1 = vmov 0.0   ;;  %v43_v2 = vld [vmem:[#allocation5] sm:$0xff] }
  0x27   :  { %179 = vmatprep.subr.bf16.mxu0 %v277_v0  ;;  %176 = vmatprep.mubr.msk.f32.mxu0 %vm278_vm0, %v279_v1  ;;  %v44_v3 = vld [vmem:[#allocation5 + $0x8] sm:$0xff]  ;;  %v45_v4 = vld [vmem:[#allocation5 + $0x10] sm:$0xff]  ;;  %v46_v6 = vld [vmem:[#allocation5 + $0x18] sm:$0xff]  ;;  %vm58_vm1 = vcmask 523264   ;;  %s280_s11 = smov [#allocation7]  }
  0x28   :  { %v180_v5 = vpack.c.bf16 %v44_v3, %v43_v2  ;;  %v41_v7 = vld [vmem:[#allocation2] sm:$0x3]  ;;  %v183_v8 = vpack.c.bf16 %v46_v6, %v45_v4  ;;  %v47_v9 = vld [vmem:[#allocation5 + $0x20] sm:$0xff]  ;;  %v48_v10 = vld [vmem:[#allocation5 + $0x28] sm:$0xff]  ;;  %s139_s12 = sshll.u32 %s280_s11, 4  ;;  %s140_s12 = int_to_ptr.vmem [resolvable:$true] %s139_s12 }
  0x29   :  { %199 = vtanh.f32 %v41_v7  ;;  %v186_v11 = vpack.c.bf16 %v48_v10, %v47_v9  ;;  %v49_v12 = vld [vmem:[#allocation5 + $0x30] sm:$0xff]  ;;  %v50_v13 = vld [vmem:[#allocation5 + $0x38] sm:$0xff]  ;;  %s245_s13 = scalar_lea.vmem %s140_s12, 32  ;;  %p250_p3 = scmp.lt.s32.totalorder %s140_s12, %s140_s12 }
  0x2a   :  { %181 = vmatpush3.bf16.msra.mxu0 %v180_v5  ;;  %v189_v14 = vpack.c.bf16 %v50_v13, %v49_v12  ;;  %v149_v16 = vld [vmem:[%s349_s2] ss:$0 sm:$0xff]  ;;  %p246_p2 = scmp.ne.s32.totalorder %s140_s12, %s245_s13  ;;  %p251_p4 = scmp.lt.s32.totalorder %s245_s13, %s245_s13 }
  0x2b   :  { %182 = vmatprep.subr.bf16.mxu0 %v277_v0 }
  0x2c   :  { %p252_p5 = por %p251_p4, %p250_p3 }
  0x2e   :  { %184 = vmatpush3.bf16.msra.mxu0 %v183_v8  ;;  %p253_p6 = pnand %p252_p5, %p246_p2 }
  0x2f   :  { %185 = vmatprep.subr.bf16.mxu0 %v277_v0 }
  0x32   :  { %187 = vmatpush3.bf16.msra.mxu0 %v186_v11 }
  0x33   :  { %188 = vmatprep.subr.bf16.mxu0 %v277_v0  ;;  %v200_v15 = vpop.eup %199 }
  0x36   :  { %190 = vmatpush3.bf16.msra.mxu0 %v189_v14 }
  0x39   :  { %177 = vmatmul.mubr.msk.f32.vlgmr.msra.gmra.mrb[0].mxu0 %vm58_vm1, %v200_v15 }
 0x10c   :  { %v128_v17 = vpop.f32.mrb[0].mxu0 }
 0x10d   :  { %v129_v18 = vadd.f32 %v149_v16, %v128_v17  ;;  %v178_v19 = vpop.f32.mrb[1].mxu0 }
 0x10f   :  { %132 = vst [vmem:[#allocation7] sm:$0x3] %v129_v18 }
 0x110   :  { %256 = shalt.err (!%p253_p6)
}
 0x111   :  { %s257_s16 = scalar_lea.hbm %s350_s3, 32 }
 0x112   :  { %p258_p7 = scmp.ne.s32.totalorder %s350_s3, %s257_s16  ;;  %p261_p8 = scmp.lt.u32.totalorder %s257_s16, %s350_s3 }
 0x114   :  { %p263_p9 = pnand %p261_p8, %p258_p7 }
 0x116   :  { %266 = shalt.err (!%p263_p9)
}
 0x117   :  { %142 = dma.vmem_to_hbm [thread:$0]  %s140_s12, 32, %s350_s3, [#allocation4]  }
 0x118   :  { %271 = dma.done.wait [#allocation4], 32  }
 0x119   :  { %272 = vsyncadd [#allocation4], 4294967264 }
 0x11a   :  { %146 = vsyncpa [#allocation3], 1 }
 0x11b   :  { %147 = vsyncpa [#allocation6], 1 }
 0x11c   :  { %148 = vsyncpa [#allocation4], 1 }

</bundles_post_ra>
